<compile_context>
chip_gen: v6e
topology: v6e:2x2x1
jax: 0.10.0
libtpu: 0.0.40
codegen_flags: <defaults>
</compile_context>

<pallas_src>
import jax
import jax.numpy as jnp
from jax import lax
from jax.experimental import pallas as pl
from jax.experimental.pallas import tpu as pltpu

EPS = 1e-5  # PyTorch nn.LayerNorm default


def _round_up(v, m):
    return (v + m - 1) // m * m


def _vmem_capacity_bytes():
    """Per-core VMEM capacity; conservative (v7x-safe) fallback if unknown."""
    try:
        info = pltpu.get_tpu_info()
        for name in ("vmem_capacity_bytes", "vmem_bytes", "vmem_size_bytes"):
            cap = getattr(info, name, None)
            if cap:
                return int(cap)
    except Exception:
        pass
    return 64 * 1024 * 1024  # v7x per-TC size; safe everywhere


def _choose_tiles(n_rows, d, d_out, x_itemsize, w_itemsize, out_itemsize,
                  vmem_cap):
    """Pick (tm, tn): row tile and output-column tile."""
    budget = int(vmem_cap * 0.70)          # working-set budget per TensorCore

    # --- tn: keep the whole D_out resident if the (double-buffered) W slab
    # fits in <=40% of the budget, else stream W in 128-aligned column tiles.
    def w_slab_bytes(tn):
        return 2 * d * tn * w_itemsize + 2 * tn * 4   # W + bias, double-buffered

    if d_out <= 128 or w_slab_bytes(d_out) <= int(budget * 0.4):
        tn = d_out
    else:
        tn = (int(budget * 0.4) // (2 * d * w_itemsize)) // 128 * 128
        tn = max(tn, 128)
        if tn >= d_out:
            tn = d_out

    # --- tm: largest row tile whose working set fits the remaining budget.
    resident = w_slab_bytes(tn) + 2 * 2 * d * 4       # + gamma/beta (2x-buffered)
    avail = max(budget - resident, 2 * 1024 * 1024)
    per_row = (2 * d * x_itemsize        # double-buffered input tile
               + 2 * tn * out_itemsize   # double-buffered output tile
               + d * w_itemsize          # normalized-row VMEM scratch
               + 2 * d * 4               # f32 LN temporaries (headroom)
               + tn * 4)                 # f32 matmul accumulator
    tm = int(avail // per_row)
    tm = min(tm, 1024)                   # diminishing returns beyond ~1024 rows
    if n_rows <= 16:
        tm = n_rows                      # single block == full row extent (legal)
    else:
        tm = min(tm, (n_rows // 16) * 16)   # never exceed the array; ragged tail ok
        if tm >= 256:
            tm = (tm // 256) * 256       # 256-aligned M tiles (v6e/v7x MXU)
        elif tm >= 128:
            tm = 128
        else:
            tm = max((tm // 16) * 16, 16)
    return int(tm), int(tn)


def _prenorm_kernel(x_ref, gamma_ref, beta_ref, w_ref, b_ref, o_ref, y_ref):
    """One (row-tile, col-tile) grid step: LN once per row tile, matmul per j."""
    @pl.when(pl.program_id(1) == 0)
    def _():
        x = x_ref[...].astype(jnp.float32)
        mean = jnp.mean(x, axis=-1, keepdims=True)
        centered = x - mean
        var = jnp.mean(centered * centered, axis=-1, keepdims=True)  # biased, torch-style
        xn = centered * lax.rsqrt(var + EPS)
        # gamma/beta pre-cast to f32 in the wrapper; store normalized rows in
        # the matmul dtype (bf16 weights -> bf16 MXU path, f32 accumulation).
        y_ref[...] = (xn * gamma_ref[...] + beta_ref[...]).astype(y_ref.dtype)

    out = jnp.dot(y_ref[...], w_ref[...], preferred_element_type=jnp.float32)
    o_ref[...] = (out + b_ref[...]).astype(o_ref.dtype)


def prenorm(x, gamma, beta, w, b, *, force_tm=None, force_tn=None):
    """x: (..., D). Returns fn(LayerNorm(x)) with fn = Linear(D, D_out)."""
    *lead, D = x.shape
    D_w, D_out = w.shape
    assert D_w == D, "weight inner dim must match LayerNorm dim"
    n_rows = 1
    for s in lead:
        n_rows *= s

    # Tiny params: pre-cast to f32 once in the wrapper (hoisted out of kernel).
    gamma = jnp.asarray(gamma, jnp.float32).reshape(1, D)
    beta = jnp.asarray(beta, jnp.float32).reshape(1, D)
    bias = jnp.asarray(b, jnp.float32).reshape(1, D_out)

    x2d = x.reshape(n_rows, D)

    vmem_cap = _vmem_capacity_bytes()
    tm, tn = _choose_tiles(n_rows, D, D_out, x.dtype.itemsize, w.dtype.itemsize,
                           x.dtype.itemsize, vmem_cap)
    if force_tm is not None:
        tm = int(force_tm)
    if force_tn is not None:
        tn = int(force_tn)

    grid = (pl.cdiv(n_rows, tm), pl.cdiv(D_out, tn))

    out2d = pl.pallas_call(
        _prenorm_kernel,
        out_shape=jax.ShapeDtypeStruct((n_rows, D_out), x.dtype),
        grid=grid,
        in_specs=[
            pl.BlockSpec((tm, D), lambda i, j: (i, 0)),    # x row tile (per i)
            pl.BlockSpec((1, D), lambda i, j: (0, 0)),     # gamma (resident)
            pl.BlockSpec((1, D), lambda i, j: (0, 0)),     # beta  (resident)
            pl.BlockSpec((D, tn), lambda i, j: (0, j)),    # W column slab
            pl.BlockSpec((1, tn), lambda i, j: (0, j)),    # bias column slab
        ],
        out_specs=pl.BlockSpec((tm, tn), lambda i, j: (i, j)),
        scratch_shapes=[pltpu.VMEM((tm, D), w.dtype)],     # normalized rows
        compiler_params=pltpu.CompilerParams(
            dimension_semantics=("parallel", "arbitrary"),
            vmem_limit_bytes=int(max(vmem_cap * 3 // 4, 32 * 1024 * 1024)),
        ),
    )(x2d, gamma, beta, w, bias)

    return out2d.reshape(*lead, D_out)


def prenorm_ref(x, gamma, beta, w, b):
    """Pure-JAX f32 reference (PyTorch LayerNorm + Linear semantics)."""
    xf = x.astype(jnp.float32)
    mean = jnp.mean(xf, axis=-1, keepdims=True)
    var = jnp.mean((xf - mean) ** 2, axis=-1, keepdims=True)
    xn = (xf - mean) / jnp.sqrt(var + EPS)
    y = xn * jnp.asarray(gamma, jnp.float32).reshape(-1) \
        + jnp.asarray(beta, jnp.float32).reshape(-1)
    out = jnp.dot(y, w.astype(jnp.float32), precision=lax.Precision.HIGHEST)
    return out + jnp.asarray(b, jnp.float32).reshape(-1)


if __name__ == "__main__":
    key = jax.random.PRNGKey(0)
    k1, k2, k3, k4 = jax.random.split(key, 4)

    # ---- Case 1: lane-dense f32 (D and D_out multiples of 128) -------------
    B, S, D, D_out = 2, 8, 128, 128
    x = jax.random.normal(k1, (B, S, D), dtype=jnp.float32)
    gamma = jnp.ones((1, D), jnp.float32)      # PyTorch default init
    beta = jnp.zeros((1, D), jnp.float32)
    w = jax.random.normal(k2, (D, D_out), jnp.float32) * 0.05
    b = jax.random.normal(k3, (1, D_out), jnp.float32) * 0.01

    out = prenorm(x, gamma, beta, w, b)
    jax.block_until_ready(out)
    ref = prenorm_ref(x, gamma, beta, w, b)
    assert out.shape == (B, S, D_out)
    assert jnp.allclose(out.astype(jnp.float32), ref, atol=5e-4, rtol=5e-4), \
        "f32 mismatch vs reference"

    # ---- Case 2: bf16 activations + bf16 weights (bf16 MXU path) -----------
    xb = x.astype(jnp.bfloat16)
    wb = w.astype(jnp.bfloat16)
    out_b = prenorm(xb, gamma, beta, wb, b)
    jax.block_until_ready(out_b)
    ref_b = prenorm_ref(xb, gamma, beta, wb, b)
    assert out_b.dtype == jnp.bfloat16
    assert jnp.allclose(out_b.astype(jnp.float32), ref_b, atol=3e-2, rtol=3e-2), \
        "bf16 mismatch vs reference"

    # ---- Case 3: non-128-aligned dims (full-extent last-dim blocks, no pad) -
    D3, Do3 = 96, 64
    x3 = jax.random.normal(k4, (B, S, D3), dtype=jnp.float32)
    g3 = 1.0 + 0.1 * jax.random.normal(k1, (1, D3), jnp.float32)
    bt3 = 0.1 * jax.random.normal(k2, (1, D3), jnp.float32)
    w3 = jax.random.normal(k3, (D3, Do3), jnp.float32) * 0.05
    b3 = jax.random.normal(k4, (1, Do3), jnp.float32) * 0.01
    out3 = prenorm(x3, g3, bt3, w3, b3)
    jax.block_until_ready(out3)
    ref3 = prenorm_ref(x3, g3, bt3, w3, b3)
    assert out3.shape == (B, S, Do3)
    assert jnp.allclose(out3.astype(jnp.float32), ref3, atol=5e-4, rtol=5e-4), \
        "non-aligned-dim mismatch vs reference"

    # ---- Case 4: ragged row count + forced D_out tiling (scratch reuse) -----
    B4, S4, D4, Do4 = 3, 7, 128, 384            # 21 rows -> ragged last row block
    x4 = jax.random.normal(k2, (B4, S4, D4), dtype=jnp.float32)
    g4 = 1.0 + 0.1 * jax.random.normal(k3, (1, D4), jnp.float32)
    bt4 = 0.1 * jax.random.normal(k4, (1, D4), jnp.float32)
    w4 = jax.random.normal(k1, (D4, Do4), jnp.float32) * 0.05
    b4 = jax.random.normal(k2, (1, Do4), jnp.float32) * 0.01
    out4 = prenorm(x4, g4, bt4, w4, b4, force_tn=128)   # 3 column tiles
    jax.block_until_ready(out4)
    ref4 = prenorm_ref(x4, g4, bt4, w4, b4)
    assert out4.shape == (B4, S4, Do4)
    assert jnp.allclose(out4.astype(jnp.float32), ref4, atol=5e-4, rtol=5e-4), \
        "ragged-row / D_out-tiled mismatch vs reference"

    print("KERNEL_OK")
</pallas_src>

<mosaic_0001>
module attributes {stable_mosaic.version = 11 : i64} {
  func.func @_prenorm_kernel(%arg0: i32, %arg1: i32, %arg2: memref<16x128xf32, #tpu.memory_space<vmem>>, %arg3: memref<1x128xf32, #tpu.memory_space<vmem>>, %arg4: memref<1x128xf32, #tpu.memory_space<vmem>>, %arg5: memref<128x128xf32, #tpu.memory_space<vmem>>, %arg6: memref<1x128xf32, #tpu.memory_space<vmem>>, %arg7: memref<16x128xf32, #tpu.memory_space<vmem>>, %arg8: memref<16x128xf32, #tpu.memory_space<vmem>>) attributes {dimension_semantics = [#tpu.dimension_semantics<parallel>, #tpu.dimension_semantics<arbitrary>], iteration_bounds = array<i64: 1, 1>, scalar_prefetch = 0 : i64, scratch_operands = 1 : i64, tpu.core_type = #tpu.core_type<tc>, window_params = [{transform_indices = @transform_0, window_bounds = array<i64: 16, 128>}, {pipeline_mode = #tpu.pipeline_mode<synchronous>, transform_indices = @transform_1, window_bounds = array<i64: 1, 128>}, {pipeline_mode = #tpu.pipeline_mode<synchronous>, transform_indices = @transform_2, window_bounds = array<i64: 1, 128>}, {transform_indices = @transform_3, window_bounds = array<i64: 128, 128>}, {transform_indices = @transform_4, window_bounds = array<i64: 1, 128>}, {transform_indices = @transform_5, window_bounds = array<i64: 16, 128>}]} {
    %c0_i32 = arith.constant 0 : i32
    %0 = arith.cmpi eq, %arg1, %c0_i32 : i32
    %1 = arith.extui %0 : i1 to i32
    %c0_i32_0 = arith.constant 0 : i32
    %2 = arith.cmpi ne, %1, %c0_i32_0 : i32
    scf.if %2 {
      %c0_8 = arith.constant 0 : index
      %c0_9 = arith.constant 0 : index
      %10 = vector.load %arg2[%c0_8, %c0_9] : memref<16x128xf32, #tpu.memory_space<vmem>>, vector<16x128xf32>
      %cst_10 = arith.constant dense<0.000000e+00> : vector<16xf32>
      %11 = vector.multi_reduction <add>, %10, %cst_10 [1] : vector<16x128xf32> to vector<16xf32>
      %12 = vector.shape_cast %11 : vector<16xf32> to vector<16x1xf32>
      %cst_11 = arith.constant 1.280000e+02 : f32
      %13 = vector.broadcast %cst_11 : f32 to vector<16x1xf32>
      %14 = arith.divf %12, %13 : vector<16x1xf32>
      %15 = vector.broadcast %14 : vector<16x1xf32> to vector<16x128xf32>
      %16 = arith.subf %10, %15 : vector<16x128xf32>
      %17 = arith.mulf %16, %16 : vector<16x128xf32>
      %cst_12 = arith.constant dense<0.000000e+00> : vector<16xf32>
      %18 = vector.multi_reduction <add>, %17, %cst_12 [1] : vector<16x128xf32> to vector<16xf32>
      %19 = vector.shape_cast %18 : vector<16xf32> to vector<16x1xf32>
      %cst_13 = arith.constant 1.280000e+02 : f32
      %20 = vector.broadcast %cst_13 : f32 to vector<16x1xf32>
      %21 = arith.divf %19, %20 : vector<16x1xf32>
      %cst_14 = arith.constant 9.99999974E-6 : f32
      %22 = vector.broadcast %cst_14 : f32 to vector<16x1xf32>
      %23 = arith.addf %21, %22 : vector<16x1xf32>
      %24 = math.rsqrt %23 : vector<16x1xf32>
      %25 = vector.broadcast %24 : vector<16x1xf32> to vector<16x128xf32>
      %26 = arith.mulf %16, %25 : vector<16x128xf32>
      %c0_15 = arith.constant 0 : index
      %c0_16 = arith.constant 0 : index
      %27 = vector.load %arg3[%c0_15, %c0_16] : memref<1x128xf32, #tpu.memory_space<vmem>>, vector<1x128xf32>
      %28 = vector.broadcast %27 : vector<1x128xf32> to vector<16x128xf32>
      %29 = arith.mulf %26, %28 : vector<16x128xf32>
      %c0_17 = arith.constant 0 : index
      %c0_18 = arith.constant 0 : index
      %30 = vector.load %arg4[%c0_17, %c0_18] : memref<1x128xf32, #tpu.memory_space<vmem>>, vector<1x128xf32>
      %31 = vector.broadcast %30 : vector<1x128xf32> to vector<16x128xf32>
      %32 = arith.addf %29, %31 : vector<16x128xf32>
      %c0_19 = arith.constant 0 : index
      %c0_20 = arith.constant 0 : index
      %33 = vector.load %arg8[%c0_19, %c0_20] : memref<16x128xf32, #tpu.memory_space<vmem>>, vector<16x128xf32>
      tpu.vector_store %arg8[%c0_19, %c0_20], %32 {strides = array<i32>} : memref<16x128xf32, #tpu.memory_space<vmem>>, vector<16x128xf32>,
    } else {
    }
    %c0 = arith.constant 0 : index
    %c0_1 = arith.constant 0 : index
    %3 = vector.load %arg8[%c0, %c0_1] : memref<16x128xf32, #tpu.memory_space<vmem>>, vector<16x128xf32>
    %c0_2 = arith.constant 0 : index
    %c0_3 = arith.constant 0 : index
    %4 = vector.load %arg5[%c0_2, %c0_3] : memref<128x128xf32, #tpu.memory_space<vmem>>, vector<128x128xf32>
    %cst = arith.constant dense<0.000000e+00> : vector<16x128xf32>
    %5 = tpu.matmul %3, %4, %cst {dimension_numbers = #tpu.dot_dimension_numbers<[1], [0], [0], [1], [0, 0, 1, 1], [], []>} : vector<16x128xf32>, vector<128x128xf32>, vector<16x128xf32> -> vector<16x128xf32>
    %c0_4 = arith.constant 0 : index
    %c0_5 = arith.constant 0 : index
    %6 = vector.load %arg6[%c0_4, %c0_5] : memref<1x128xf32, #tpu.memory_space<vmem>>, vector<1x128xf32>
    %7 = vector.broadcast %6 : vector<1x128xf32> to vector<16x128xf32>
    %8 = arith.addf %5, %7 : vector<16x128xf32>
    %c0_6 = arith.constant 0 : index
    %c0_7 = arith.constant 0 : index
    %9 = vector.load %arg7[%c0_6, %c0_7] : memref<16x128xf32, #tpu.memory_space<vmem>>, vector<16x128xf32>
    tpu.vector_store %arg7[%c0_6, %c0_7], %8 {strides = array<i32>} : memref<16x128xf32, #tpu.memory_space<vmem>>, vector<16x128xf32>,
    return
  }
  func.func @transform_0(%arg0: i32, %arg1: i32) -> (i32, i32) {
    %c0_i32 = arith.constant 0 : i32
    %c0_i32_0 = arith.constant 0 : i32
    return %arg0, %c0_i32 : i32, i32
  }
  func.func @transform_1(%arg0: i32, %arg1: i32) -> (i32, i32) {
    %c0_i32 = arith.constant 0 : i32
    %c0_i32_0 = arith.constant 0 : i32
    %c0_i32_1 = arith.constant 0 : i32
    return %c0_i32, %c0_i32_0 : i32, i32
  }
  func.func @transform_2(%arg0: i32, %arg1: i32) -> (i32, i32) {
    %c0_i32 = arith.constant 0 : i32
    %c0_i32_0 = arith.constant 0 : i32
    %c0_i32_1 = arith.constant 0 : i32
    return %c0_i32, %c0_i32_0 : i32, i32
  }
  func.func @transform_3(%arg0: i32, %arg1: i32) -> (i32, i32) {
    %c0_i32 = arith.constant 0 : i32
    %c0_i32_0 = arith.constant 0 : i32
    return %c0_i32, %arg1 : i32, i32
  }
  func.func @transform_4(%arg0: i32, %arg1: i32) -> (i32, i32) {
    %c0_i32 = arith.constant 0 : i32
    %c0_i32_0 = arith.constant 0 : i32
    return %c0_i32, %arg1 : i32, i32
  }
  func.func @transform_5(%arg0: i32, %arg1: i32) -> (i32, i32) {
    %c0_i32 = arith.constant 0 : i32
    return %arg0, %arg1 : i32, i32
  }
}

</mosaic_0001>

<bundles_post_ra>
// kernel: tpu_custom_call.1
= control target key start
LH: loop header
LB: loop body
LE: loop exit
PB: predicated region body
PF: predicated region fallthrough
CT: control target
= control target key end

     0   :  { %10 = vsyncpa [#allocation4], 0  ;;  %s411_s0 = inlined_call_operand.hbm [shape: f32[16,128], index: 0, kind: input, shape index: {}]   ;;  %s412_s1 = inlined_call_operand.vmem [shape: f32[1,128], index: 1, kind: input, shape index: {}]   ;;  %s413_s2 = inlined_call_operand.vmem [shape: f32[1,128], index: 2, kind: input, shape index: {}]   ;;  %s414_s3 = inlined_call_operand.hbm [shape: f32[128,128], index: 3, kind: input, shape index: {}]   ;;  %s415_s4 = inlined_call_operand.vmem [shape: f32[1,128], index: 4, kind: input, shape index: {}]   ;;  %s416_s5 = inlined_call_operand.hbm [shape: f32[16,128], index: 5, kind: output, shape index: {}]  }
   0x1   :  { %11 = vsyncpa [#allocation7], 0 }
   0x2   :  { %12 = vsyncpa [#allocation5], 0  ;;  %s349_s18 = smov [#allocation3]  }
   0x3   :  { %s18_s19 = sshll.u32 %s349_s18, 4  ;;  %s19_s19 = int_to_ptr.vmem [resolvable:$true] %s18_s19 }
   0x4   :  { %s291_s20 = scalar_lea.vmem %s19_s19, 256  ;;  %p296_p1 = scmp.lt.s32.totalorder %s19_s19, %s19_s19 }
   0x5   :  { %p292_p0 = scmp.ne.s32.totalorder %s19_s19, %s291_s20  ;;  %p297_p2 = scmp.lt.s32.totalorder %s291_s20, %s291_s20 }
   0x7   :  { %p298_p3 = por %p297_p2, %p296_p1 }
   0x9   :  { %p299_p4 = pnand %p298_p3, %p292_p0 }
   0xb   :  { %302 = shalt.err (!%p299_p4)
}
   0xc   :  { %s350_s21 = smov 128   ;;  %s351_s22 = smov 8  }
   0xd   :  { %24 = dma.hbm_to_vmem [thread:$0]  %s411_s0, 256, %s19_s19, [#allocation4], %s350_s21, %s350_s21, %s351_s22  }
   0xe   :  { %s352_s25 = smov [#allocation6]  }
   0xf   :  { %s34_s26 = sshll.u32 %s352_s25, 4  ;;  %s35_s26 = int_to_ptr.vmem [resolvable:$true] %s34_s26 }
  0x10   :  { %s311_s27 = scalar_lea.vmem %s35_s26, 2048  ;;  %p316_p6 = scmp.lt.s32.totalorder %s35_s26, %s35_s26 }
  0x11   :  { %p312_p5 = scmp.ne.s32.totalorder %s35_s26, %s311_s27  ;;  %p317_p7 = scmp.lt.s32.totalorder %s311_s27, %s311_s27 }
  0x13   :  { %p318_p8 = por %p317_p7, %p316_p6 }
  0x15   :  { %p319_p9 = pnand %p318_p8, %p312_p5 }
  0x17   :  { %322 = shalt.err (!%p319_p9)
}
  0x18   :  { %40 = dma.hbm_to_vmem [thread:$0]  %s414_s3, 2048, %s35_s26, [#allocation7], %s350_s21, %s350_s21, %s351_s22  }
  0x19   :  { %343 = dma.done.wait [#allocation4], 256  }
  0x1a   :  { %344 = vsyncadd [#allocation4], 4294967040 }
  0x1b   :  { %345 = dma.done.wait [#allocation7], 2048  }
  0x1c   :  { %346 = vsyncadd [#allocation7], 4294965248  ;;  %v53_v0 = vld [vmem:[#allocation3] sm:$0xff]  ;;  %v54_v1 = vld [vmem:[#allocation3 + $0x8] sm:$0xff]  ;;  %s353_s9 = smov [#allocation8]  }
  0x1d   :  { %55 = vadd.xlane.f32.xlu0 %v53_v0  ;;  %v115_v2 = vld [vmem:[#allocation6 + $0x78] sm:$0xff]  ;;  %v114_v3 = vld [vmem:[#allocation6 + $0x70] sm:$0xff]  ;;  %v113_v12 = vld [vmem:[#allocation6 + $0x68] sm:$0xff] }
  0x1e   :  { %239 = vmatprep.subr.mxu0 %v115_v2  ;;  %v112_v13 = vld [vmem:[#allocation6 + $0x60] sm:$0xff]  ;;  %v111_v14 = vld [vmem:[#allocation6 + $0x58] sm:$0xff]  ;;  %v110_v15 = vld [vmem:[#allocation6 + $0x50] sm:$0xff] }
  0x1f   :  { %240 = vmatpush3.msra.mxu0 %v115_v2  ;;  %v109_v16 = vld [vmem:[#allocation6 + $0x48] sm:$0xff]  ;;  %v108_v17 = vld [vmem:[#allocation6 + $0x40] sm:$0xff]  ;;  %v107_v18 = vld [vmem:[#allocation6 + $0x38] sm:$0xff] }
  0x20   :  { %241 = vmatprep.subr.mxu0 %v114_v3  ;;  %v106_v19 = vld [vmem:[#allocation6 + $0x30] sm:$0xff]  ;;  %v105_v20 = vld [vmem:[#allocation6 + $0x28] sm:$0xff]  ;;  %v104_v21 = vld [vmem:[#allocation6 + $0x20] sm:$0xff] }
  0x21   :  { %57 = vadd.xlane.f32.xlu0 %v54_v1  ;;  %242 = vmatpush3.msra.mxu0 %v114_v3  ;;  %v103_v22 = vld [vmem:[#allocation6 + $0x18] sm:$0xff]  ;;  %v102_v23 = vld [vmem:[#allocation6 + $0x10] sm:$0xff]  ;;  %v101_v24 = vld [vmem:[#allocation6 + $0x8] sm:$0xff] }
  0x22   :  { %243 = vmatprep.subr.mxu0 %v113_v12  ;;  %v100_v25 = vld [vmem:[#allocation6] sm:$0xff]  ;;  %v218_v33 = vld [vmem:[%s412_s1] ss:$0 sm:$0xff]  ;;  %s205_s1 = sshll.u32 %s353_s9, 4  ;;  %s206_s1 = int_to_ptr.vmem [resolvable:$true] %s205_s1 }
  0x23   :  { %244 = vmatpush3.msra.mxu0 %v113_v12  ;;  %v219_v35 = vld [vmem:[%s413_s2] ss:$0 sm:$0xff]  ;;  %s323_s2 = scalar_lea.vmem %s206_s1, 256  ;;  %p328_p11 = scmp.lt.s32.totalorder %s206_s1, %s206_s1 }
  0x24   :  { %245 = vmatprep.subr.mxu0 %v112_v13  ;;  %v220_v42 = vld [vmem:[%s415_s4] ss:$0 sm:$0xff]  ;;  %p324_p10 = scmp.ne.s32.totalorder %s206_s1, %s323_s2  ;;  %p329_p12 = scmp.lt.s32.totalorder %s323_s2, %s323_s2 }
  0x25   :  { %246 = vmatpush3.msra.mxu0 %v112_v13 }
  0x26   :  { %247 = vmatprep.subr.mxu0 %v111_v14  ;;  %p330_p13 = por %p329_p12, %p328_p11 }
  0x27   :  { %248 = vmatpush3.msra.mxu0 %v111_v14 }
  0x28   :  { %249 = vmatprep.subr.mxu0 %v110_v15  ;;  %p331_p0 = pnand %p330_p13, %p324_p10 }
  0x29   :  { %250 = vmatpush3.msra.mxu0 %v110_v15 }
  0x2a   :  { %251 = vmatprep.subr.mxu0 %v109_v16 }
  0x2b   :  { %252 = vmatpush3.msra.mxu0 %v109_v16 }
  0x2c   :  { %253 = vmatprep.subr.mxu0 %v108_v17 }
  0x2d   :  { %254 = vmatpush3.msra.mxu0 %v108_v17 }
  0x2e   :  { %255 = vmatprep.subr.mxu0 %v107_v18 }
  0x2f   :  { %256 = vmatpush3.msra.mxu0 %v107_v18 }
  0x30   :  { %257 = vmatprep.subr.mxu0 %v106_v19 }
  0x31   :  { %258 = vmatpush3.msra.mxu0 %v106_v19 }
  0x32   :  { %259 = vmatprep.subr.mxu0 %v105_v20 }
  0x33   :  { %260 = vmatpush3.msra.mxu0 %v105_v20 }
  0x34   :  { %261 = vmatprep.subr.mxu0 %v104_v21 }
  0x35   :  { %262 = vmatpush3.msra.mxu0 %v104_v21 }
  0x36   :  { %263 = vmatprep.subr.mxu0 %v103_v22 }
  0x37   :  { %264 = vmatpush3.msra.mxu0 %v103_v22 }
  0x38   :  { %265 = vmatprep.subr.mxu0 %v102_v23 }
  0x39   :  { %266 = vmatpush3.msra.mxu0 %v102_v23 }
  0x3a   :  { %267 = vmatprep.subr.mxu0 %v101_v24 }
  0x3b   :  { %268 = vmatpush3.msra.mxu0 %v101_v24 }
  0x3c   :  { %269 = vmatprep.subr.mxu0 %v100_v25 }
  0x3d   :  { %270 = vmatpush3.msra.mxu0 %v100_v25 }
  0xa6   :  { %v56_v4 = vpop.xlane.xlu0 %55 }
  0xa7   :  { %v60_v5 = vmul.f32 0.0078125, %v56_v4 }
  0xa9   :  { %v62_v6 = vsub.f32 %v53_v0, %v60_v5 }
  0xaa   :  { %v58_v7 = vpop.xlane.xlu0 %57 }
  0xab   :  { %v61_v8 = vmul.f32 0.0078125, %v58_v7  ;;  %v64_v9 = vmul.f32 %v62_v6, %v62_v6 }
  0xad   :  { %v63_v10 = vsub.f32 %v54_v1, %v61_v8  ;;  %66 = vadd.xlane.f32.xlu1 %v64_v9 }
  0xaf   :  { %v65_v11 = vmul.f32 %v63_v10, %v63_v10 }
  0xb1   :  { %68 = vadd.xlane.f32.xlu1 %v65_v11 }
 0x136   :  { %v67_v26 = vpop.xlane.xlu1 %66 }
 0x137   :  { %v70_v27 = vmul.f32 0.0078125, %v67_v26 }
 0x139   :  { %v72_v28 = vadd.f32 1e-05, %v70_v27 }
 0x13a   :  { %v69_v29 = vpop.xlane.xlu1 %68 }
 0x13b   :  { %279 = vrsqrt.f32 %v72_v28  ;;  %v71_v30 = vmul.f32 0.0078125, %v69_v29 }
 0x13d   :  { %v73_v31 = vadd.f32 1e-05, %v71_v30 }
 0x13f   :  { %281 = vrsqrt.f32 %v73_v31 }
 0x148   :  { %v280_v32 = vpop.eup %279 }
 0x149   :  { %v76_v34 = vmul.f32 %v280_v32, %v62_v6 }
 0x14b   :  { %v85_v36 = vmul.f32 %v218_v33, %v76_v34 }
 0x14c   :  { %v282_v37 = vpop.eup %281 }
 0x14d   :  { %v77_v38 = vmul.f32 %v282_v37, %v63_v10  ;;  %v94_v39 = vadd.f32 %v219_v35, %v85_v36 }
 0x14f   :  { %v86_v40 = vmul.f32 %v218_v33, %v77_v38  ;;  %271 = vmatprep.mubr.f32.mxu0 %v94_v39 }
 0x151   :  { %v95_v41 = vadd.f32 %v219_v35, %v86_v40 }
 0x153   :  { %272 = vmatmul.mubr.f32.vlgmr.msra.gmra.mxu0 %v95_v41 }
 0x213   :  { %v273_v43 = vpop.f32.mrf.mxu0 }
 0x214   :  { %v195_v44 = vadd.f32 %v273_v43, %v220_v42 }
 0x215   :  { %v189_v45 = vpop.f32.mrf.mxu0 }
 0x216   :  { %199 = vst [vmem:[#allocation8 + $0x8] sm:$0xff] %v195_v44  ;;  %v190_v46 = vadd.f32 %v220_v42, %v189_v45 }
 0x218   :  { %198 = vst [vmem:[#allocation8] sm:$0xff] %v190_v46 }
 0x219   :  { %334 = shalt.err (!%p331_p0)
}
 0x21a   :  { %211 = dma.vmem_to_hbm [thread:$0]  %s206_s1, 256, %s416_s5, [#allocation5], %s350_s21, %s350_s21, %s351_s22  }
 0x21b   :  { %347 = dma.done.wait [#allocation5], 256  }
 0x21c   :  { %348 = vsyncadd [#allocation5], 4294967040 }
 0x21d   :  { %215 = vsyncpa [#allocation4], 1 }
 0x21e   :  { %216 = vsyncpa [#allocation7], 1 }
 0x21f   :  { %217 = vsyncpa [#allocation5], 1 }

</bundles_post_ra>
